<compile_context>
chip_gen: v5e
topology: v5e:2x2
jax: 0.10.0
libtpu: 0.0.40
codegen_flags: <defaults>
</compile_context>

<pallas_src>
import numpy as np
import jax
import jax.numpy as jnp
from jax.experimental import pallas as pl
from jax.experimental.pallas import tpu as pltpu

HIDDEN = 128          # per-branch hidden width
H2 = 2 * HIDDEN       # fused hidden width (actor | critic)


# ---------------------------------------------------------------------------
# Per-generation dispatch (module-level: evaluated once, not per call)
# ---------------------------------------------------------------------------
def _device_kind():
    try:
        return jax.devices()[0].device_kind.lower()
    except Exception:
        return ""


_DEVICE_KIND = _device_kind()
# v5e / v5p have 4x128x128 MXUs: a block-diagonal 256x256 matmul wastes half
# the MXU tiles on zeros, so split layer 2 into two 128x128 dots there.
_SPLIT_LAYER2 = "v5" in _DEVICE_KIND
# Chips with 2 TensorCores (v7x; v4/v5p megacore) want an even parallel grid.
_TWO_CORES = any(t in _DEVICE_KIND for t in ("v7", "v5p", "v4"))
# VMEM budget: v7x has 64 MiB physical VMEM per core; others have 128 MiB.
_VMEM_LIMIT = (48 if "v7" in _DEVICE_KIND else 64) * 1024 * 1024


# ---------------------------------------------------------------------------
# Pallas kernels: fully fused actor+critic MLP
# ---------------------------------------------------------------------------
def actor_critic_kernel_fused(x_ref, w1_ref, b1_ref, w2_ref, b2_ref,
                              w3_ref, b3_ref, out_ref):
    """v6e/v7x path: single 256-contraction block-diagonal layer-2 MXU pass."""
    x = x_ref[...]                                            # [tile, obs_dim]

    # Fused layer 1: actor half = lanes 0:128, critic half = lanes 128:256.
    h = jnp.tanh(
        jnp.dot(x, w1_ref[...], preferred_element_type=jnp.float32) + b1_ref[...]
    )                                                         # [tile, 256]

    # Layer 2: off-diagonal blocks of w2 are exactly zero -> no actor/critic
    # leak; one 2x256x256 MXU pass.
    h2 = jnp.tanh(
        jnp.dot(h, w2_ref[...], preferred_element_type=jnp.float32) + b2_ref[...]
    )                                                         # [tile, 256]

    # Fused layer 3: mean in cols 0:act_dim, value in col act_dim.
    # Narrow (tile, n_out) store: 16x less HBM writeback than lane-padding.
    out_ref[...] = (
        jnp.dot(h2, w3_ref[...], preferred_element_type=jnp.float32) + b3_ref[...]
    )


def actor_critic_kernel_split(x_ref, w1_ref, b1_ref, w2a_ref, w2c_ref, b2_ref,
                              w3_ref, b3_ref, out_ref):
    """v5e/v5p path: two 128x128 layer-2 dots, halves never concatenated."""
    x = x_ref[...]                                            # [tile, obs_dim]

    h = jnp.tanh(
        jnp.dot(x, w1_ref[...], preferred_element_type=jnp.float32) + b1_ref[...]
    )                                                         # [tile, 256]

    ha = h[:, :HIDDEN]                                        # lane-aligned view
    hc = h[:, HIDDEN:]
    h2a = jnp.tanh(
        jnp.dot(ha, w2a_ref[...], preferred_element_type=jnp.float32)
        + b2_ref[:, :HIDDEN])                                 # [tile, 128]
    h2c = jnp.tanh(
        jnp.dot(hc, w2c_ref[...], preferred_element_type=jnp.float32)
        + b2_ref[:, HIDDEN:])                                 # [tile, 128]

    # Layer 3 as two accumulating dots (identical MXU pass count, no lane
    # concatenate / re-layout on the critical path).
    out_ref[...] = (
        jnp.dot(h2a, w3_ref[:HIDDEN, :], preferred_element_type=jnp.float32)
        + jnp.dot(h2c, w3_ref[HIDDEN:, :], preferred_element_type=jnp.float32)
        + b3_ref[...]
    )


# ---------------------------------------------------------------------------
# Tiling helper
# ---------------------------------------------------------------------------
def _select_tile(B, tile_b, two_cores):
    """Pad the batch and pick a batch tile; even grid on 2-TensorCore chips."""
    b_pad = max(8, -(-B // 8) * 8)
    if two_cores:
        # Guarantee an even number of parallel grid steps so both cores work.
        b_pad = max(16, -(-b_pad // 16) * 16)
        if b_pad <= 2 * tile_b:
            tile = b_pad // 2
        else:
            tile = tile_b
            b_pad = -(-b_pad // (2 * tile)) * (2 * tile)
    else:
        if b_pad <= tile_b:
            tile = b_pad
        else:
            tile = tile_b
            b_pad = -(-b_pad // tile) * tile
    return b_pad, tile


# ---------------------------------------------------------------------------
# Wrapper
# ---------------------------------------------------------------------------
def actor_critic_forward(x, fused, *, tile_b=2048):
    """Returns (mean, std, value) matching ActorCritic.forward semantics:
    dist = Normal(mean, std), value = critic(x).squeeze(-1)."""
    B, obs_dim = x.shape
    act_dim = fused["act_dim"]
    n_out = fused["n_out"]

    b_pad, tile = _select_tile(B, tile_b, _TWO_CORES)
    if b_pad != B:
        # Padded rows produce garbage activations; they are sliced off below.
        x = jnp.pad(x, ((0, b_pad - B), (0, 0)))
    grid = (b_pad // tile,)

    # Grid-invariant weight/bias specs: constant index_map -> DMA'd once,
    # resident across all batch tiles.
    def wspec(shape):
        return pl.BlockSpec(shape, lambda i: (0, 0))

    x_spec = pl.BlockSpec((tile, obs_dim), lambda i: (i, 0))
    out_spec = pl.BlockSpec((tile, n_out), lambda i: (i, 0))

    if _SPLIT_LAYER2:
        kernel = actor_critic_kernel_split
        operands = (x, fused["w1"], fused["b1"], fused["w2a"], fused["w2c"],
                    fused["b2"], fused["w3"], fused["b3"])
        in_specs = [
            x_spec,
            wspec((obs_dim, H2)),          # W1 (fused actor|critic)
            wspec((1, H2)),                # b1
            wspec((HIDDEN, HIDDEN)),       # W2 actor block
            wspec((HIDDEN, HIDDEN)),       # W2 critic block
            wspec((1, H2)),                # b2
            wspec((H2, n_out)),            # W3 (mean | value)
            wspec((1, n_out)),             # b3
        ]
        l2_flops = 2 * (2 * HIDDEN * HIDDEN)
        weight_bytes = 4 * (obs_dim * H2 + H2 + 2 * HIDDEN * HIDDEN + H2
                            + H2 * n_out + n_out)
    else:
        kernel = actor_critic_kernel_fused
        operands = (x, fused["w1"], fused["b1"], fused["w2"], fused["b2"],
                    fused["w3"], fused["b3"])
        in_specs = [
            x_spec,
            wspec((obs_dim, H2)),          # W1 (fused actor|critic)
            wspec((1, H2)),                # b1
            wspec((H2, H2)),               # W2 (block-diagonal)
            wspec((1, H2)),                # b2
            wspec((H2, n_out)),            # W3 (mean | value)
            wspec((1, n_out)),             # b3
        ]
        l2_flops = 2 * (H2 * H2)
        weight_bytes = 4 * (obs_dim * H2 + H2 + H2 * H2 + H2
                            + H2 * n_out + n_out)

    flops = b_pad * (2 * obs_dim * H2 + l2_flops + 2 * H2 * n_out)
    transcendentals = b_pad * 2 * H2            # two tanh layers of width 256
    bytes_accessed = weight_bytes + 4 * b_pad * (obs_dim + n_out)

    out = pl.pallas_call(
        kernel,
        out_shape=jax.ShapeDtypeStruct((b_pad, n_out), jnp.float32),
        grid=grid,
        in_specs=in_specs,
        out_specs=out_spec,
        compiler_params=pltpu.CompilerParams(
            dimension_semantics=("parallel",),
            vmem_limit_bytes=_VMEM_LIMIT,
        ),
        cost_estimate=pl.CostEstimate(
            flops=flops,
            transcendentals=transcendentals,
            bytes_accessed=bytes_accessed,
        ),
    )(*operands)

    mean = out[:B, :act_dim]
    value = out[:B, act_dim]
    # std depends only on log_std (not x) -> compute outside the kernel.
    std = jnp.broadcast_to(jnp.exp(fused["log_std"]), mean.shape)
    return mean, std, value


# ---------------------------------------------------------------------------
# Deterministic parameter initialization (orthogonal(gain=sqrt(2)), zero bias)
# ---------------------------------------------------------------------------
def _orthogonal(key, out_dim, in_dim, gain):
    # Mirrors nn.init.orthogonal_ for a (out_dim, in_dim) weight.
    rows, cols = out_dim, in_dim
    flat = jax.random.normal(key, (rows, cols), jnp.float32)
    if rows < cols:
        flat = flat.T
    q, r = jnp.linalg.qr(flat)
    q = q * jnp.sign(jnp.diag(r))[None, :]
    if rows < cols:
        q = q.T
    return gain * q[:rows, :cols]


def init_raw_params(key, obs_dim, act_dim, hidden=HIDDEN):
    gain = float(np.sqrt(2.0))
    keys = jax.random.split(key, 6)
    # PyTorch Linear stores weight as (out, in); kernel wants (in, out).
    w1a = _orthogonal(keys[0], hidden, obs_dim, gain).T
    w2a = _orthogonal(keys[1], hidden, hidden, gain).T
    w3a = _orthogonal(keys[2], act_dim, hidden, gain).T
    w1c = _orthogonal(keys[3], hidden, obs_dim, gain).T
    w2c = _orthogonal(keys[4], hidden, hidden, gain).T
    w3c = _orthogonal(keys[5], 1, hidden, gain).T
    z = lambda n: jnp.zeros((1, n), jnp.float32)
    return {
        "w1a": w1a, "b1a": z(hidden),
        "w2a": w2a, "b2a": z(hidden),
        "w3a": w3a, "b3a": z(act_dim),
        "w1c": w1c, "b1c": z(hidden),
        "w2c": w2c, "b2c": z(hidden),
        "w3c": w3c, "b3c": z(1),
        "log_std": jnp.zeros((1, act_dim), jnp.float32),
    }


def fuse_params(raw, act_dim, hidden=HIDDEN):
    """Build the fused/padded kernel parameters once (not per call)."""
    h2 = 2 * hidden
    # Narrow fused output: mean in cols 0:act_dim, value in col act_dim,
    # padded to a multiple of 8 lanes.
    n_out = max(8, -(-(act_dim + 1) // 8) * 8)

    w1 = jnp.concatenate([raw["w1a"], raw["w1c"]], axis=1)            # [obs, 256]
    b1 = jnp.concatenate([raw["b1a"], raw["b1c"]], axis=1)            # [1, 256]

    # Block-diagonal layer 2 (fused path) + the two raw diagonal blocks
    # (split path) so v5e/v5p never fetch the guaranteed-zero sub-blocks.
    w2 = jnp.zeros((h2, h2), jnp.float32)
    w2 = w2.at[:hidden, :hidden].set(raw["w2a"])
    w2 = w2.at[hidden:, hidden:].set(raw["w2c"])
    b2 = jnp.concatenate([raw["b2a"], raw["b2c"]], axis=1)            # [1, 256]

    w3 = jnp.zeros((h2, n_out), jnp.float32)
    w3 = w3.at[:hidden, :act_dim].set(raw["w3a"])
    w3 = w3.at[hidden:, act_dim:act_dim + 1].set(raw["w3c"])          # [256, n_out]
    b3 = jnp.zeros((1, n_out), jnp.float32)
    b3 = b3.at[:, :act_dim].set(raw["b3a"])
    b3 = b3.at[:, act_dim:act_dim + 1].set(raw["b3c"])

    return {"w1": w1, "b1": b1,
            "w2": w2, "w2a": raw["w2a"], "w2c": raw["w2c"], "b2": b2,
            "w3": w3, "b3": b3,
            "log_std": raw["log_std"], "act_dim": act_dim, "n_out": n_out}


# ---------------------------------------------------------------------------
# Pure-JAX reference (unfused) for a sanity check
# ---------------------------------------------------------------------------
def reference_forward(x, p):
    h = jnp.tanh(x @ p["w1a"] + p["b1a"])
    h = jnp.tanh(h @ p["w2a"] + p["b2a"])
    mean = h @ p["w3a"] + p["b3a"]
    std = jnp.broadcast_to(jnp.exp(p["log_std"]), mean.shape)
    hc = jnp.tanh(x @ p["w1c"] + p["b1c"])
    hc = jnp.tanh(hc @ p["w2c"] + p["b2c"])
    value = (hc @ p["w3c"] + p["b3c"])[:, 0]
    return mean, std, value


if __name__ == "__main__":
    # BipedalWalker-v3: obs_dim=24, act_dim=4; small batch for the example.
    # TODO(synk): Normal(...).sample()/log_prob and action clamping from
    # get_action are host-side distribution ops, not part of this kernel.
    obs_dim, act_dim, batch = 24, 4, 8

    key = jax.random.PRNGKey(0)
    k_params, k_x = jax.random.split(key)
    raw = init_raw_params(k_params, obs_dim, act_dim)
    fused = fuse_params(raw, act_dim)
    x = jax.random.normal(k_x, (batch, obs_dim), jnp.float32)

    mean, std, value = actor_critic_forward(x, fused)
    jax.block_until_ready((mean, std, value))

    mean_r, std_r, value_r = reference_forward(x, raw)
    assert mean.shape == (batch, act_dim)
    assert std.shape == (batch, act_dim)
    assert value.shape == (batch,)
    np.testing.assert_allclose(np.asarray(mean), np.asarray(mean_r), rtol=1e-5, atol=1e-5)
    np.testing.assert_allclose(np.asarray(std), np.asarray(std_r), rtol=1e-5, atol=1e-5)
    np.testing.assert_allclose(np.asarray(value), np.asarray(value_r), rtol=1e-5, atol=1e-5)

    print("KERNEL_OK")
</pallas_src>

<mosaic_0001>
module attributes {stable_mosaic.version = 11 : i64} {
  func.func @actor_critic_kernel_fused(%arg0: i32, %arg1: memref<8x24xf32, #tpu.memory_space<vmem>>, %arg2: memref<24x256xf32, #tpu.memory_space<vmem>>, %arg3: memref<1x256xf32, #tpu.memory_space<vmem>>, %arg4: memref<256x256xf32, #tpu.memory_space<vmem>>, %arg5: memref<1x256xf32, #tpu.memory_space<vmem>>, %arg6: memref<256x8xf32, #tpu.memory_space<vmem>>, %arg7: memref<1x8xf32, #tpu.memory_space<vmem>>, %arg8: memref<8x8xf32, #tpu.memory_space<vmem>>) attributes {dimension_semantics = [#tpu.dimension_semantics<parallel>], iteration_bounds = array<i64: 1>, scalar_prefetch = 0 : i64, scratch_operands = 0 : i64, tpu.core_type = #tpu.core_type<tc>, window_params = [{transform_indices = @transform_0, window_bounds = array<i64: 8, 24>}, {pipeline_mode = #tpu.pipeline_mode<synchronous>, transform_indices = @transform_1, window_bounds = array<i64: 24, 256>}, {pipeline_mode = #tpu.pipeline_mode<synchronous>, transform_indices = @transform_2, window_bounds = array<i64: 1, 256>}, {pipeline_mode = #tpu.pipeline_mode<synchronous>, transform_indices = @transform_3, window_bounds = array<i64: 256, 256>}, {pipeline_mode = #tpu.pipeline_mode<synchronous>, transform_indices = @transform_4, window_bounds = array<i64: 1, 256>}, {pipeline_mode = #tpu.pipeline_mode<synchronous>, transform_indices = @transform_5, window_bounds = array<i64: 256, 8>}, {pipeline_mode = #tpu.pipeline_mode<synchronous>, transform_indices = @transform_6, window_bounds = array<i64: 1, 8>}, {transform_indices = @transform_7, window_bounds = array<i64: 8, 8>}]} {
    %c0 = arith.constant 0 : index
    %c0_0 = arith.constant 0 : index
    %0 = vector.load %arg1[%c0, %c0_0] : memref<8x24xf32, #tpu.memory_space<vmem>>, vector<8x24xf32>
    %c0_1 = arith.constant 0 : index
    %c0_2 = arith.constant 0 : index
    %1 = vector.load %arg2[%c0_1, %c0_2] : memref<24x256xf32, #tpu.memory_space<vmem>>, vector<24x256xf32>
    %cst = arith.constant dense<0.000000e+00> : vector<8x256xf32>
    %2 = tpu.matmul %0, %1, %cst {dimension_numbers = #tpu.dot_dimension_numbers<[1], [0], [0], [1], [0, 0, 1, 1], [], []>} : vector<8x24xf32>, vector<24x256xf32>, vector<8x256xf32> -> vector<8x256xf32>
    %c0_3 = arith.constant 0 : index
    %c0_4 = arith.constant 0 : index
    %3 = vector.load %arg3[%c0_3, %c0_4] : memref<1x256xf32, #tpu.memory_space<vmem>>, vector<1x256xf32>
    %4 = vector.broadcast %3 : vector<1x256xf32> to vector<8x256xf32>
    %5 = arith.addf %2, %4 : vector<8x256xf32>
    %6 = math.tanh %5 : vector<8x256xf32>
    %c0_5 = arith.constant 0 : index
    %c0_6 = arith.constant 0 : index
    %7 = vector.load %arg4[%c0_5, %c0_6] : memref<256x256xf32, #tpu.memory_space<vmem>>, vector<256x256xf32>
    %cst_7 = arith.constant dense<0.000000e+00> : vector<8x256xf32>
    %8 = tpu.matmul %6, %7, %cst_7 {dimension_numbers = #tpu.dot_dimension_numbers<[1], [0], [0], [1], [0, 0, 1, 1], [], []>} : vector<8x256xf32>, vector<256x256xf32>, vector<8x256xf32> -> vector<8x256xf32>
    %c0_8 = arith.constant 0 : index
    %c0_9 = arith.constant 0 : index
    %9 = vector.load %arg5[%c0_8, %c0_9] : memref<1x256xf32, #tpu.memory_space<vmem>>, vector<1x256xf32>
    %10 = vector.broadcast %9 : vector<1x256xf32> to vector<8x256xf32>
    %11 = arith.addf %8, %10 : vector<8x256xf32>
    %12 = math.tanh %11 : vector<8x256xf32>
    %c0_10 = arith.constant 0 : index
    %c0_11 = arith.constant 0 : index
    %13 = vector.load %arg6[%c0_10, %c0_11] : memref<256x8xf32, #tpu.memory_space<vmem>>, vector<256x8xf32>
    %cst_12 = arith.constant dense<0.000000e+00> : vector<8x8xf32>
    %14 = tpu.matmul %12, %13, %cst_12 {dimension_numbers = #tpu.dot_dimension_numbers<[1], [0], [0], [1], [0, 0, 1, 1], [], []>} : vector<8x256xf32>, vector<256x8xf32>, vector<8x8xf32> -> vector<8x8xf32>
    %c0_13 = arith.constant 0 : index
    %c0_14 = arith.constant 0 : index
    %15 = vector.load %arg7[%c0_13, %c0_14] : memref<1x8xf32, #tpu.memory_space<vmem>>, vector<1x8xf32>
    %16 = vector.broadcast %15 : vector<1x8xf32> to vector<8x8xf32>
    %17 = arith.addf %14, %16 : vector<8x8xf32>
    %c0_15 = arith.constant 0 : index
    %c0_16 = arith.constant 0 : index
    %18 = vector.load %arg8[%c0_15, %c0_16] : memref<8x8xf32, #tpu.memory_space<vmem>>, vector<8x8xf32>
    tpu.vector_store %arg8[%c0_15, %c0_16], %17 {strides = array<i32>} : memref<8x8xf32, #tpu.memory_space<vmem>>, vector<8x8xf32>,
    return
  }
  func.func @transform_0(%arg0: i32) -> (i32, i32) {
    %c0_i32 = arith.constant 0 : i32
    %c0_i32_0 = arith.constant 0 : i32
    return %arg0, %c0_i32 : i32, i32
  }
  func.func @transform_1(%arg0: i32) -> (i32, i32) {
    %c0_i32 = arith.constant 0 : i32
    %c0_i32_0 = arith.constant 0 : i32
    %c0_i32_1 = arith.constant 0 : i32
    return %c0_i32, %c0_i32_0 : i32, i32
  }
  func.func @transform_2(%arg0: i32) -> (i32, i32) {
    %c0_i32 = arith.constant 0 : i32
    %c0_i32_0 = arith.constant 0 : i32
    %c0_i32_1 = arith.constant 0 : i32
    return %c0_i32, %c0_i32_0 : i32, i32
  }
  func.func @transform_3(%arg0: i32) -> (i32, i32) {
    %c0_i32 = arith.constant 0 : i32
    %c0_i32_0 = arith.constant 0 : i32
    %c0_i32_1 = arith.constant 0 : i32
    return %c0_i32, %c0_i32_0 : i32, i32
  }
  func.func @transform_4(%arg0: i32) -> (i32, i32) {
    %c0_i32 = arith.constant 0 : i32
    %c0_i32_0 = arith.constant 0 : i32
    %c0_i32_1 = arith.constant 0 : i32
    return %c0_i32, %c0_i32_0 : i32, i32
  }
  func.func @transform_5(%arg0: i32) -> (i32, i32) {
    %c0_i32 = arith.constant 0 : i32
    %c0_i32_0 = arith.constant 0 : i32
    %c0_i32_1 = arith.constant 0 : i32
    return %c0_i32, %c0_i32_0 : i32, i32
  }
  func.func @transform_6(%arg0: i32) -> (i32, i32) {
    %c0_i32 = arith.constant 0 : i32
    %c0_i32_0 = arith.constant 0 : i32
    %c0_i32_1 = arith.constant 0 : i32
    return %c0_i32, %c0_i32_0 : i32, i32
  }
  func.func @transform_7(%arg0: i32) -> (i32, i32) {
    %c0_i32 = arith.constant 0 : i32
    %c0_i32_0 = arith.constant 0 : i32
    return %arg0, %c0_i32 : i32, i32
  }
}

</mosaic_0001>

<bundles_post_ra>
// kernel: tpu_custom_call.1
= control target key start
LH: loop header
LB: loop body
LE: loop exit
PB: predicated region body
PF: predicated region fallthrough
CT: control target
= control target key end

     0   :  { %12 = vsyncpa [#allocation3], 0  ;;  %s592_s0 = inlined_call_operand.vmem [shape: f32[8,24], index: 0, kind: input, shape index: {}]   ;;  %s593_s1 = inlined_call_operand.vmem [shape: f32[24,256], index: 1, kind: input, shape index: {}]   ;;  %s594_s2 = inlined_call_operand.vmem [shape: f32[1,256], index: 2, kind: input, shape index: {}]   ;;  %s595_s3 = inlined_call_operand.hbm [shape: f32[256,256], index: 3, kind: input, shape index: {}]   ;;  %s596_s4 = inlined_call_operand.vmem [shape: f32[1,256], index: 4, kind: input, shape index: {}]   ;;  %s597_s5 = inlined_call_operand.vmem [shape: f32[256,8], index: 5, kind: input, shape index: {}]   ;;  %s598_s6 = inlined_call_operand.vmem [shape: f32[1,8], index: 6, kind: input, shape index: {}]   ;;  %s599_s7 = inlined_call_operand.hbm [shape: f32[8,8], index: 7, kind: output, shape index: {}]  }
   0x1   :  { %13 = vsyncpa [#allocation4], 0  ;;  %s24_s26 = sshll.u32 %s595_s3, 4  ;;  %s416_s27 = smov [#allocation2]   ;;  %s25_s26 = int_to_ptr.hbm [resolvable:$true] %s24_s26 }
   0x2   :  { %s26_s28 = sshll.u32 %s416_s27, 4  ;;  %s417_s29 = smov 256   ;;  %s27_s28 = int_to_ptr.vmem [resolvable:$true] %s26_s28 }
   0x3   :  { %s418_s30 = smov 16  }
   0x4   :  { %32 = dma.hbm_to_vmem [thread:$0]  %s25_s26, 8192, %s27_s28, [#allocation3], %s417_s29, %s417_s29, %s418_s30  }
   0x5   :  { %412 = dma.done.wait [#allocation3], 8192  }
   0x6   :  { %413 = vsyncadd [#allocation3], 4294959104  ;;  %v48_v0 = vld [vmem:[%s593_s1 + $0x20] sm:$0xff]  ;;  %v46_v1 = vld [vmem:[%s593_s1 + $0x10] sm:$0xff]  ;;  %vm56_vm0 = vcmask 195584   ;;  %s339_s3 = sshll.u32 %s599_s7, 4  ;;  %s340_s3 = int_to_ptr.hbm [resolvable:$true] %s339_s3 }
   0x7   :  { %v49_v2 = vld [vmem:[%s593_s1 + $0x28] sm:$0xff]  ;;  %73 = vmatpush.msra.mxu0 %v48_v0  ;;  %v47_v3 = vld [vmem:[%s593_s1 + $0x18] sm:$0xff]  ;;  %v44_v4 = vld [vmem:[%s593_s1] sm:$0xff]  ;;  %vm330_vm1 = vcmask 64512  }
   0x8   :  { %93 = vmatpush.msra.mxu1 %v49_v2  ;;  %v45_v5 = vld [vmem:[%s593_s1 + $0x8] sm:$0xff]  ;;  %v132_v6 = vld [vmem:[#allocation2 + $0xf0] sm:$0xff]  ;;  %v43_v7 = vld [vmem:[%s592_s0] sm:$0xff] }
   0x9   :  { %74 = vmatpush.msra.mxu0 %v46_v1  ;;  %v164_v8 = vld [vmem:[#allocation2 + $0x1f0] sm:$0xff]  ;;  %172 = vmatpush.msra.mxu2 %v132_v6  ;;  %v133_v9 = vld [vmem:[#allocation2 + $0xf8] sm:$0xff]  ;;  %v130_v10 = vld [vmem:[#allocation2 + $0xe0] sm:$0xff] }
   0xa   :  { %94 = vmatpush.msra.mxu1 %v47_v3  ;;  %192 = vmatpush.msra.mxu3 %v164_v8  ;;  %v165_v11 = vld [vmem:[#allocation2 + $0x1f8] sm:$0xff]  ;;  %v162_v12 = vld [vmem:[#allocation2 + $0x1e0] sm:$0xff]  ;;  %v131_v13 = vld [vmem:[#allocation2 + $0xe8] sm:$0xff] }
   0xb   :  { %75 = vmatpush.msra.mxu0 %v44_v4  ;;  %v128_v14 = vld [vmem:[#allocation2 + $0xd0] sm:$0xff]  ;;  %173 = vmatpush.msra.mxu2 %v130_v10  ;;  %v163_v15 = vld [vmem:[#allocation2 + $0x1e8] sm:$0xff]  ;;  %v129_v17 = vld [vmem:[#allocation2 + $0xd8] sm:$0xff] }
   0xc   :  { %95 = vmatpush.msra.mxu1 %v45_v5  ;;  %349 = vmatmul.msk.f32.vlgmr.msra.gmra.mxu0 %vm56_vm0, %v43_v7  ;;  %v160_v16 = vld [vmem:[#allocation2 + $0x1d0] sm:$0xff]  ;;  %v126_v18 = vld [vmem:[#allocation2 + $0xc0] sm:$0xff]  ;;  %v161_v19 = vld [vmem:[#allocation2 + $0x1d8] sm:$0xff] }
   0xd   :  { %350 = vmatmul.msk.f32.vlgmr.msra.gmra.mxu1 %vm56_vm0, %v43_v7  ;;  %212 = vmatpush.msrb.mxu0 %v133_v9  ;;  %v158_v20 = vld [vmem:[#allocation2 + $0x1c0] sm:$0xff]  ;;  %v127_v21 = vld [vmem:[#allocation2 + $0xc8] sm:$0xff]  ;;  %v124_v22 = vld [vmem:[#allocation2 + $0xb0] sm:$0xff] }
   0xe   :  { %232 = vmatpush.msrb.mxu1 %v165_v11  ;;  %193 = vmatpush.msra.mxu3 %v162_v12  ;;  %v159_v23 = vld [vmem:[#allocation2 + $0x1c8] sm:$0xff]  ;;  %v156_v24 = vld [vmem:[#allocation2 + $0x1b0] sm:$0xff]  ;;  %v125_v25 = vld [vmem:[#allocation2 + $0xb8] sm:$0xff] }
   0xf   :  { %213 = vmatpush.msrb.mxu0 %v131_v13  ;;  %174 = vmatpush.msra.mxu2 %v128_v14  ;;  %v122_v26 = vld [vmem:[#allocation2 + $0xa0] sm:$0xff]  ;;  %v157_v27 = vld [vmem:[#allocation2 + $0x1b8] sm:$0xff]  ;;  %v123_v29 = vld [vmem:[#allocation2 + $0xa8] sm:$0xff] }
  0x10   :  { %233 = vmatpush.msrb.mxu1 %v163_v15  ;;  %194 = vmatpush.msra.mxu3 %v160_v16  ;;  %v154_v28 = vld [vmem:[#allocation2 + $0x1a0] sm:$0xff]  ;;  %v120_v30 = vld [vmem:[#allocation2 + $0x90] sm:$0xff]  ;;  %v155_v31 = vld [vmem:[#allocation2 + $0x1a8] sm:$0xff] }
  0x11   :  { %214 = vmatpush.msrb.mxu0 %v129_v17  ;;  %175 = vmatpush.msra.mxu2 %v126_v18  ;;  %v152_v32 = vld [vmem:[#allocation2 + $0x190] sm:$0xff]  ;;  %v121_v33 = vld [vmem:[#allocation2 + $0x98] sm:$0xff]  ;;  %v118_v34 = vld [vmem:[#allocation2 + $0x80] sm:$0xff] }
  0x12   :  { %234 = vmatpush.msrb.mxu1 %v161_v19  ;;  %195 = vmatpush.msra.mxu3 %v158_v20  ;;  %v153_v35 = vld [vmem:[#allocation2 + $0x198] sm:$0xff]  ;;  %v150_v36 = vld [vmem:[#allocation2 + $0x180] sm:$0xff]  ;;  %v119_v37 = vld [vmem:[#allocation2 + $0x88] sm:$0xff] }
  0x13   :  { %215 = vmatpush.msrb.mxu0 %v127_v21  ;;  %176 = vmatpush.msra.mxu2 %v124_v22  ;;  %v116_v38 = vld [vmem:[#allocation2 + $0x70] sm:$0xff]  ;;  %v151_v39 = vld [vmem:[#allocation2 + $0x188] sm:$0xff]  ;;  %v117_v41 = vld [vmem:[#allocation2 + $0x78] sm:$0xff] }
  0x14   :  { %235 = vmatpush.msrb.mxu1 %v159_v23  ;;  %196 = vmatpush.msra.mxu3 %v156_v24  ;;  %v148_v40 = vld [vmem:[#allocation2 + $0x170] sm:$0xff]  ;;  %v114_v42 = vld [vmem:[#allocation2 + $0x60] sm:$0xff]  ;;  %v149_v43 = vld [vmem:[#allocation2 + $0x178] sm:$0xff] }
  0x15   :  { %216 = vmatpush.msrb.mxu0 %v125_v25  ;;  %177 = vmatpush.msra.mxu2 %v122_v26  ;;  %v146_v44 = vld [vmem:[#allocation2 + $0x160] sm:$0xff]  ;;  %v115_v45 = vld [vmem:[#allocation2 + $0x68] sm:$0xff]  ;;  %v112_v46 = vld [vmem:[#allocation2 + $0x50] sm:$0xff] }
  0x16   :  { %236 = vmatpush.msrb.mxu1 %v157_v27  ;;  %197 = vmatpush.msra.mxu3 %v154_v28  ;;  %v147_v47 = vld [vmem:[#allocation2 + $0x168] sm:$0xff]  ;;  %v113_v48 = vld [vmem:[#allocation2 + $0x58] sm:$0xff]  ;;  %v110_v49 = vld [vmem:[#allocation2 + $0x40] sm:$0xff] }
  0x17   :  { %217 = vmatpush.msrb.mxu0 %v123_v29  ;;  %178 = vmatpush.msra.mxu2 %v120_v30  ;;  %v144_v50 = vld [vmem:[#allocation2 + $0x150] sm:$0xff]  ;;  %v111_v51 = vld [vmem:[#allocation2 + $0x48] sm:$0xff]  ;;  %v145_v52 = vld [vmem:[#allocation2 + $0x158] sm:$0xff] }
  0x18   :  { %237 = vmatpush.msrb.mxu1 %v155_v31  ;;  %198 = vmatpush.msra.mxu3 %v152_v32  ;;  %v108_v53 = vld [vmem:[#allocation2 + $0x30] sm:$0xff]  ;;  %v142_v54 = vld [vmem:[#allocation2 + $0x140] sm:$0xff]  ;;  %v109_v55 = vld [vmem:[#allocation2 + $0x38] sm:$0xff] }
  0x19   :  { %218 = vmatpush.msrb.mxu0 %v121_v33  ;;  %179 = vmatpush.msra.mxu2 %v118_v34  ;;  %v143_v56 = vld [vmem:[#allocation2 + $0x148] sm:$0xff]  ;;  %v106_v57 = vld [vmem:[#allocation2 + $0x20] sm:$0xff]  ;;  %v140_v58 = vld [vmem:[#allocation2 + $0x130] sm:$0xff] }
  0x1a   :  { %238 = vmatpush.msrb.mxu1 %v153_v35  ;;  %199 = vmatpush.msra.mxu3 %v150_v36  ;;  %v107_v59 = vld [vmem:[#allocation2 + $0x28] sm:$0xff]  ;;  %v141_v60 = vld [vmem:[#allocation2 + $0x138] sm:$0xff]  ;;  %v104_v61 = vld [vmem:[#allocation2 + $0x10] sm:$0xff] }
  0x1b   :  { %219 = vmatpush.msrb.mxu0 %v119_v37  ;;  %180 = vmatpush.msra.mxu2 %v116_v38  ;;  %v138_v62 = vld [vmem:[#allocation2 + $0x120] sm:$0xff]  ;;  %v105_v63 = vld [vmem:[#allocation2 + $0x18] sm:$0xff]  ;;  %v139_v0 = vld [vmem:[#allocation2 + $0x128] sm:$0xff] }
  0x1c   :  { %239 = vmatpush.msrb.mxu1 %v151_v39  ;;  %200 = vmatpush.msra.mxu3 %v148_v40  ;;  %v102_v1 = vld [vmem:[#allocation2] sm:$0xff]  ;;  %v136_v2 = vld [vmem:[#allocation2 + $0x110] sm:$0xff]  ;;  %v103_v3 = vld [vmem:[#allocation2 + $0x8] sm:$0xff] }
  0x1d   :  { %220 = vmatpush.msrb.mxu0 %v117_v41  ;;  %181 = vmatpush.msra.mxu2 %v114_v42  ;;  %v137_v4 = vld [vmem:[#allocation2 + $0x118] sm:$0xff]  ;;  %v134_v5 = vld [vmem:[#allocation2 + $0x100] sm:$0xff]  ;;  %v135_v6 = vld [vmem:[#allocation2 + $0x108] sm:$0xff] }
  0x1e   :  { %240 = vmatpush.msrb.mxu1 %v149_v43  ;;  %201 = vmatpush.msra.mxu3 %v146_v44  ;;  %v285_v7 = vld [vmem:[%s597_s5 + $0xf8] sm:$0xff]  ;;  %v284_v8 = vld [vmem:[%s597_s5 + $0xf0] sm:$0xff]  ;;  %v283_v11 = vld [vmem:[%s597_s5 + $0xe8] sm:$0xff] }
  0x1f   :  { %221 = vmatpush.msrb.mxu0 %v115_v45  ;;  %182 = vmatpush.msra.mxu2 %v112_v46  ;;  %v269_v9 = vld [vmem:[%s597_s5 + $0x78] sm:$0xff]  ;;  %v268_v10 = vld [vmem:[%s597_s5 + $0x70] sm:$0xff]  ;;  %v267_v12 = vld [vmem:[%s597_s5 + $0x68] sm:$0xff] }
  0x20   :  { %241 = vmatpush.msrb.mxu1 %v147_v47  ;;  %202 = vmatpush.msra.mxu3 %v144_v50  ;;  %v282_v13 = vld [vmem:[%s597_s5 + $0xe0] sm:$0xff]  ;;  %v281_v15 = vld [vmem:[%s597_s5 + $0xd8] sm:$0xff]  ;;  %v280_v17 = vld [vmem:[%s597_s5 + $0xd0] sm:$0xff] }
  0x21   :  { %222 = vmatpush.msrb.mxu0 %v113_v48  ;;  %183 = vmatpush.msra.mxu2 %v110_v49  ;;  %v266_v14 = vld [vmem:[%s597_s5 + $0x60] sm:$0xff]  ;;  %v265_v16 = vld [vmem:[%s597_s5 + $0x58] sm:$0xff]  ;;  %v264_v18 = vld [vmem:[%s597_s5 + $0x50] sm:$0xff] }
  0x22   :  { %242 = vmatpush.msrb.mxu1 %v145_v52  ;;  %203 = vmatpush.msra.mxu3 %v142_v54  ;;  %v279_v19 = vld [vmem:[%s597_s5 + $0xc8] sm:$0xff]  ;;  %v278_v21 = vld [vmem:[%s597_s5 + $0xc0] sm:$0xff]  ;;  %v277_v22 = vld [vmem:[%s597_s5 + $0xb8] sm:$0xff] }
  0x23   :  { %223 = vmatpush.msrb.mxu0 %v111_v51  ;;  %184 = vmatpush.msra.mxu2 %v108_v53  ;;  %v263_v20 = vld [vmem:[%s597_s5 + $0x48] sm:$0xff]  ;;  %v50_v23 = vld [vmem:[%s594_s2] sm:$0x3]  ;;  %v276_v24 = vld [vmem:[%s597_s5 + $0xb0] sm:$0xff] }
  0x24   :  { %243 = vmatpush.msrb.mxu1 %v143_v56  ;;  %204 = vmatpush.msra.mxu3 %v140_v58  ;;  %v52_v25 = vperm.slane %v50_v23, 0  ;;  %v53_v26 = vperm.slane %v50_v23, 1  ;;  %v262_v33 = vld [vmem:[%s597_s5 + $0x40] sm:$0xff]  ;;  %v275_v34 = vld [vmem:[%s597_s5 + $0xa8] sm:$0xff]  ;;  %v261_v35 = vld [vmem:[%s597_s5 + $0x38] sm:$0xff] }
  0x25   :  { %224 = vmatpush.msrb.mxu0 %v109_v55  ;;  %185 = vmatpush.msra.mxu2 %v106_v57  ;;  %v274_v36 = vld [vmem:[%s597_s5 + $0xa0] sm:$0xff]  ;;  %v260_v37 = vld [vmem:[%s597_s5 + $0x30] sm:$0xff]  ;;  %v273_v38 = vld [vmem:[%s597_s5 + $0x98] sm:$0xff] }
  0x26   :  { %244 = vmatpush.msrb.mxu1 %v141_v60  ;;  %205 = vmatpush.msra.mxu3 %v138_v62  ;;  %v259_v39 = vld [vmem:[%s597_s5 + $0x28] sm:$0xff]  ;;  %v272_v40 = vld [vmem:[%s597_s5 + $0x90] sm:$0xff]  ;;  %v258_v41 = vld [vmem:[%s597_s5 + $0x20] sm:$0xff] }
  0x27   :  { %225 = vmatpush.msrb.mxu0 %v107_v59  ;;  %186 = vmatpush.msra.mxu2 %v104_v61  ;;  %v271_v42 = vld [vmem:[%s597_s5 + $0x88] sm:$0xff]  ;;  %v257_v43 = vld [vmem:[%s597_s5 + $0x18] sm:$0xff]  ;;  %v270_v44 = vld [vmem:[%s597_s5 + $0x80] sm:$0xff] }
  0x28   :  { %245 = vmatpush.msrb.mxu1 %v139_v0  ;;  %206 = vmatpush.msra.mxu3 %v136_v2  ;;  %v256_v45 = vld [vmem:[%s597_s5 + $0x10] sm:$0xff]  ;;  %v255_v46 = vld [vmem:[%s597_s5 + $0x8] sm:$0xff]  ;;  %v254_v47 = vld [vmem:[%s597_s5] sm:$0xff] }
  0x29   :  { %226 = vmatpush.msrb.mxu0 %v105_v63  ;;  %187 = vmatpush.msra.mxu2 %v102_v1  ;;  %v166_v48 = vld [vmem:[%s596_s4] sm:$0x3]  ;;  %s419_s4 = smov [#allocation5]  }
  0x2a   :  { %246 = vmatpush.msrb.mxu1 %v137_v4  ;;  %207 = vmatpush.msra.mxu3 %v134_v5  ;;  %v169_v49 = vperm.slane %v166_v48, 1  ;;  %v168_v54 = vperm.slane %v166_v48, 0  ;;  %v355_v61 = vld [vmem:[%s598_s6] ss:$0 sm:$0xff]  ;;  %s337_s11 = sshll.u32 %s419_s4, 4  ;;  %s338_s11 = int_to_ptr.vmem [resolvable:$true] %s337_s11 }
  0x2b   :  { %227 = vmatpush.msrb.mxu0 %v103_v3  ;;  %290 = vmatpush.msrb.mxu2 %v269_v9 }
  0x2c   :  { %247 = vmatpush.msrb.mxu1 %v135_v6  ;;  %310 = vmatpush.msrb.mxu3 %v285_v7 }
  0x2d   :  { %291 = vmatpush.msrb.mxu2 %v268_v10 }
  0x2e   :  { %311 = vmatpush.msrb.mxu3 %v284_v8 }
  0x2f   :  { %292 = vmatpush.msrb.mxu2 %v267_v12 }
  0x30   :  { %312 = vmatpush.msrb.mxu3 %v283_v11 }
  0x31   :  { %293 = vmatpush.msrb.mxu2 %v266_v14 }
  0x32   :  { %313 = vmatpush.msrb.mxu3 %v282_v13 }
  0x33   :  { %294 = vmatpush.msrb.mxu2 %v265_v16 }
  0x34   :  { %314 = vmatpush.msrb.mxu3 %v281_v15 }
  0x35   :  { %295 = vmatpush.msrb.mxu2 %v264_v18 }
  0x36   :  { %315 = vmatpush.msrb.mxu3 %v280_v17 }
  0x37   :  { %296 = vmatpush.msrb.mxu2 %v263_v20 }
  0x38   :  { %316 = vmatpush.msrb.mxu3 %v279_v19 }
  0x39   :  { %297 = vmatpush.msrb.mxu2 %v262_v33 }
  0x3a   :  { %317 = vmatpush.msrb.mxu3 %v278_v21 }
  0x3b   :  { %298 = vmatpush.msrb.mxu2 %v261_v35 }
  0x3c   :  { %318 = vmatpush.msrb.mxu3 %v277_v22 }
  0x3d   :  { %299 = vmatpush.msrb.mxu2 %v260_v37 }
  0x3e   :  { %319 = vmatpush.msrb.mxu3 %v276_v24 }
  0x3f   :  { %300 = vmatpush.msrb.mxu2 %v259_v39 }
  0x40   :  { %320 = vmatpush.msrb.mxu3 %v275_v34 }
  0x41   :  { %301 = vmatpush.msrb.mxu2 %v258_v41 }
  0x42   :  { %321 = vmatpush.msrb.mxu3 %v274_v36 }
  0x43   :  { %302 = vmatpush.msrb.mxu2 %v257_v43 }
  0x44   :  { %322 = vmatpush.msrb.mxu3 %v273_v38 }
  0x45   :  { %303 = vmatpush.msrb.mxu2 %v256_v45 }
  0x46   :  { %323 = vmatpush.msrb.mxu3 %v272_v40 }
  0x47   :  { %304 = vmatpush.msrb.mxu2 %v255_v46 }
  0x48   :  { %324 = vmatpush.msrb.mxu3 %v271_v42 }
  0x49   :  { %305 = vmatpush.msrb.mxu2 %v254_v47 }
  0x4a   :  { %325 = vmatpush.msrb.mxu3 %v270_v44 }
  0x89   :  { %v77_v27 = vpop.f32.mrf.mxu0 }
  0x8a   :  { %v97_v28 = vpop.f32.mrf.mxu1  ;;  %v78_v29 = vadd.f32 %v77_v27, %v52_v25 }
  0x8b   :  { %v98_v30 = vadd.f32 %v97_v28, %v53_v26 }
  0x8c   :  { %356 = vtanh.f32 %v78_v29 }
  0x8d   :  { %358 = vtanh.f32 %v98_v30 }
  0x92   :  { %v357_v31 = vpop.eup %356 }
  0x93   :  { %v359_v32 = vpop.eup %358  ;;  %188 = vmatmul.f32.vlgmr.msra.gmra.mxu2 %v357_v31  ;;  %228 = vmatmul.f32.vlgmr.msrb.gmra.mxu0 %v357_v31 }
  0x94   :  { %208 = vmatmul.f32.vlgmr.msra.gmra.mxu3 %v359_v32  ;;  %248 = vmatmul.f32.vlgmr.msrb.gmra.mxu1 %v359_v32 }
 0x110   :  { %v229_v50 = vpop.f32.mrf.mxu0 }
 0x111   :  { %v230_v51 = vadd.f32 %v229_v50, %v169_v49  ;;  %v249_v52 = vpop.f32.mrf.mxu1 }
 0x113   :  { %v250_v53 = vadd.f32 %v249_v52, %v230_v51 }
 0x115   :  { %360 = vtanh.f32 %v250_v53 }
 0x116   :  { %v189_v55 = vpop.f32.mrf.mxu2 }
 0x117   :  { %v190_v56 = vadd.f32 %v189_v55, %v168_v54  ;;  %v209_v57 = vpop.f32.mrf.mxu3 }
 0x119   :  { %v210_v58 = vadd.f32 %v209_v57, %v190_v56 }
 0x11b   :  { %v361_v59 = vpop.eup %360  ;;  %362 = vtanh.f32 %v210_v58 }
 0x11c   :  { %326 = vmatmul.f32.vlgmr.msrb.gmra.mxu3 %v361_v59 }
 0x121   :  { %v363_v60 = vpop.eup %362 }
 0x122   :  { %306 = vmatmul.f32.vlgmr.msrb.gmra.mxu2 %v363_v60 }
 0x19f   :  { %v327_v0 = vpop.f32.mrf.mxu3 }
 0x1a5   :  { %v307_v62 = vpop.f32.mrf.mxu2 }
 0x1a6   :  { %v308_v63 = vadd.f32 %v355_v61, %v307_v62 }
 0x1a8   :  { %v328_v1 = vadd.f32 %v327_v0, %v308_v63 }
 0x1aa   :  { %331 = vst.msk [vmem:[#allocation5] sm:$0xff] %vm330_vm1, %v328_v1 }
 0x1ab   :  { %342 = dma.vmem_to_hbm [thread:$0]  %s338_s11, 128, %s340_s3, [#allocation4]  }
 0x1ac   :  { %414 = dma.done.wait [#allocation4], 128  }
 0x1ad   :  { %415 = vsyncadd [#allocation4], 4294967168 }
 0x1ae   :  { %347 = vsyncpa [#allocation3], 1 }
 0x1af   :  { %348 = vsyncpa [#allocation4], 1 }

</bundles_post_ra>
